<compile_context>
chip_gen: v7x
topology: tpu7x:2x2x1
jax: 0.10.0
libtpu: 0.0.40
codegen_flags: <defaults>
</compile_context>

<pallas_src>
import functools

import jax
import jax.numpy as jnp
from jax.experimental import pallas as pl
from jax.experimental.pallas import tpu as pltpu


def _residual_linear_kernel(x_ref, w_ref, b_ref, o_ref, *, matmul_dtype):
    # fn(x) + x  with fn = Linear(D, D);   x_ref: (TILE_M, D), w_ref: (D, D)
    x = x_ref[...]
    # MXU matmul with f32 accumulation. Casts are no-ops when matmul_dtype
    # equals the input dtype; with bf16 they hit the full-rate MXU path.
    y = jnp.dot(x.astype(matmul_dtype), w_ref[...].astype(matmul_dtype),
                preferred_element_type=jnp.float32)
    # Bias + residual add in f32 (VPU); downcast only at the final store so
    # small-magnitude residuals keep full precision.
    y = y + b_ref[...].astype(jnp.float32)
    o_ref[...] = (y + x.astype(jnp.float32)).astype(o_ref.dtype)


def residual_linear(x, w, b, *, block_m=512, matmul_dtype=None, donate_x=False):
    """Computes Linear(x) + x.

    x: (M, D) tokens-major, D on the 128-lane axis.
    w: (D, D) stored [in, out] so the kernel computes x @ W.
    b: (D,)
    block_m:       token-tile size (rows). Large tiles (512-1024 f32) approach
                   the HBM roofline; clamped to M for small inputs.
    matmul_dtype:  dtype fed to the MXU (default: x.dtype). Use jnp.bfloat16 on
                   v6e/v7x for full-rate matmul; accumulation stays f32.
    donate_x:      alias x's HBM buffer to the output (caller must not reuse x).
    """
    M, D = x.shape
    assert w.shape == (D, D) and b.shape == (D,)
    if matmul_dtype is None:
        matmul_dtype = x.dtype

    tile_m = min(block_m, M)
    grid_m = pl.cdiv(M, tile_m)
    b2d = b.reshape(1, D)

    # Resident working set: W + bias stay in VMEM, x/out tiles are double-buffered.
    est_vmem = (w.size * w.dtype.itemsize
                + b2d.size * b2d.dtype.itemsize
                + 2 * tile_m * D * x.dtype.itemsize      # x tiles (2 buffers)
                + 2 * tile_m * D * x.dtype.itemsize)     # out tiles (2 buffers)
    vmem_limit = None
    if est_vmem > 32 * 1024 * 1024:
        # Raise the scoped limit but keep headroom below v7x's 64 MiB physical.
        vmem_limit = min(est_vmem + (8 << 20), 60 * 1024 * 1024)

    kernel = functools.partial(_residual_linear_kernel, matmul_dtype=matmul_dtype)

    bytes_accessed = (x.size * x.dtype.itemsize
                      + w.size * w.dtype.itemsize
                      + b.size * b.dtype.itemsize
                      + M * D * x.dtype.itemsize)

    return pl.pallas_call(
        kernel,
        out_shape=jax.ShapeDtypeStruct((M, D), x.dtype),
        grid_spec=pltpu.PrefetchScalarGridSpec(
            num_scalar_prefetch=0,
            grid=(grid_m,),
            in_specs=[
                pl.BlockSpec((tile_m, D), lambda i: (i, 0)),  # x: streamed M tiles
                pl.BlockSpec((D, D), lambda i: (0, 0)),       # W: VMEM-resident
                pl.BlockSpec((1, D), lambda i: (0, 0)),       # bias: VMEM-resident
            ],
            out_specs=pl.BlockSpec((tile_m, D), lambda i: (i, 0)),
        ),
        compiler_params=pltpu.CompilerParams(
            dimension_semantics=("parallel",),   # M tiles independent -> megacore
            vmem_limit_bytes=vmem_limit),
        cost_estimate=pl.CostEstimate(
            flops=2 * M * D * D,
            transcendentals=0,
            bytes_accessed=bytes_accessed),
        input_output_aliases=({0: 0} if donate_x else {}),
    )(x, w, b2d)


if __name__ == "__main__":
    # Small transformer-style shapes: batch=2, seq=64, hidden=128 -> M=128, D=128.
    batch, seq, hidden = 2, 64, 128

    key = jax.random.PRNGKey(0)
    kx, kw, kb = jax.random.split(key, 3)

    x = jax.random.normal(kx, (batch, seq, hidden), dtype=jnp.float32)
    # Deterministic "Linear(hidden, hidden)" params (synthetic, not a checkpoint).
    w = jax.random.normal(kw, (hidden, hidden), dtype=jnp.float32) * 0.02
    b = jax.random.normal(kb, (hidden,), dtype=jnp.float32) * 0.01

    x2d = x.reshape(batch * seq, hidden)           # layout: [tokens, dim]
    ref = x2d @ w + b[None, :] + x2d               # fn(x) + x reference

    # 1) Default f32 path.
    out = residual_linear(x2d, w, b)
    jax.block_until_ready(out)
    assert jnp.allclose(out, ref, atol=2e-4, rtol=2e-4), "mismatch (f32 path)"

    # 2) Multi-tile pipelined path (grid over M, W stays resident).
    out_tiled = residual_linear(x2d, w, b, block_m=32)
    jax.block_until_ready(out_tiled)
    assert jnp.allclose(out_tiled, ref, atol=2e-4, rtol=2e-4), "mismatch (tiled path)"

    # 3) bf16 MXU path (f32 accumulation, f32 bias + residual).
    out_bf16 = residual_linear(x2d, w, b, matmul_dtype=jnp.bfloat16)
    jax.block_until_ready(out_bf16)
    ref_bf16 = (jnp.dot(x2d.astype(jnp.bfloat16), w.astype(jnp.bfloat16),
                        preferred_element_type=jnp.float32)
                + b[None, :] + x2d)
    assert jnp.allclose(out_bf16, ref_bf16, atol=5e-3, rtol=5e-3), "mismatch (bf16 path)"

    out3d = out.reshape(batch, seq, hidden)
    jax.block_until_ready(out3d)
    print("KERNEL_OK")
</pallas_src>

<mosaic_0001>
module attributes {stable_mosaic.version = 11 : i64} {
  func.func @_residual_linear_kernel(%arg0: i32, %arg1: memref<128x128xf32, #tpu.memory_space<vmem>>, %arg2: memref<128x128xf32, #tpu.memory_space<vmem>>, %arg3: memref<1x128xf32, #tpu.memory_space<vmem>>, %arg4: memref<128x128xf32, #tpu.memory_space<vmem>>) attributes {dimension_semantics = [#tpu.dimension_semantics<parallel>], iteration_bounds = array<i64: 1>, scalar_prefetch = 0 : i64, scratch_operands = 0 : i64, tpu.core_type = #tpu.core_type<tc>, window_params = [{transform_indices = @transform_0, window_bounds = array<i64: 128, 128>}, {pipeline_mode = #tpu.pipeline_mode<synchronous>, transform_indices = @transform_1, window_bounds = array<i64: 128, 128>}, {pipeline_mode = #tpu.pipeline_mode<synchronous>, transform_indices = @transform_2, window_bounds = array<i64: 1, 128>}, {transform_indices = @transform_3, window_bounds = array<i64: 128, 128>}]} {
    %c0 = arith.constant 0 : index
    %c0_0 = arith.constant 0 : index
    %0 = vector.load %arg1[%c0, %c0_0] : memref<128x128xf32, #tpu.memory_space<vmem>>, vector<128x128xf32>
    %c0_1 = arith.constant 0 : index
    %c0_2 = arith.constant 0 : index
    %1 = vector.load %arg2[%c0_1, %c0_2] : memref<128x128xf32, #tpu.memory_space<vmem>>, vector<128x128xf32>
    %cst = arith.constant dense<0.000000e+00> : vector<128x128xf32>
    %2 = tpu.matmul %0, %1, %cst {dimension_numbers = #tpu.dot_dimension_numbers<[1], [0], [0], [1], [0, 0, 1, 1], [], []>} : vector<128x128xf32>, vector<128x128xf32>, vector<128x128xf32> -> vector<128x128xf32>
    %c0_3 = arith.constant 0 : index
    %c0_4 = arith.constant 0 : index
    %3 = vector.load %arg3[%c0_3, %c0_4] : memref<1x128xf32, #tpu.memory_space<vmem>>, vector<1x128xf32>
    %4 = vector.broadcast %3 : vector<1x128xf32> to vector<128x128xf32>
    %5 = arith.addf %2, %4 : vector<128x128xf32>
    %6 = arith.addf %5, %0 : vector<128x128xf32>
    %c0_5 = arith.constant 0 : index
    %c0_6 = arith.constant 0 : index
    %7 = vector.load %arg4[%c0_5, %c0_6] : memref<128x128xf32, #tpu.memory_space<vmem>>, vector<128x128xf32>
    tpu.vector_store %arg4[%c0_5, %c0_6], %6 {strides = array<i32>} : memref<128x128xf32, #tpu.memory_space<vmem>>, vector<128x128xf32>,
    return
  }
  func.func @transform_0(%arg0: i32) -> (i32, i32) {
    %c0_i32 = arith.constant 0 : i32
    %c0_i32_0 = arith.constant 0 : i32
    return %arg0, %c0_i32 : i32, i32
  }
  func.func @transform_1(%arg0: i32) -> (i32, i32) {
    %c0_i32 = arith.constant 0 : i32
    %c0_i32_0 = arith.constant 0 : i32
    %c0_i32_1 = arith.constant 0 : i32
    return %c0_i32, %c0_i32_0 : i32, i32
  }
  func.func @transform_2(%arg0: i32) -> (i32, i32) {
    %c0_i32 = arith.constant 0 : i32
    %c0_i32_0 = arith.constant 0 : i32
    %c0_i32_1 = arith.constant 0 : i32
    return %c0_i32, %c0_i32_0 : i32, i32
  }
  func.func @transform_3(%arg0: i32) -> (i32, i32) {
    %c0_i32 = arith.constant 0 : i32
    %c0_i32_0 = arith.constant 0 : i32
    return %arg0, %c0_i32 : i32, i32
  }
}

</mosaic_0001>

<bundles_post_ra>
// kernel: tpu_custom_call.1
= control target key start
LH: loop header
LB: loop body
LE: loop exit
PB: predicated region body
PF: predicated region fallthrough
CT: control target
= control target key end

     0   :  { %8 = vsyncpa [#allocation3], 0  ;;  %s588_s0 = inlined_call_operand.hbm [shape: f32[128,128], index: 0, kind: input, shape index: {}]   ;;  %s589_s1 = inlined_call_operand.hbm [shape: f32[128,128], index: 1, kind: input, shape index: {}]   ;;  %s590_s2 = inlined_call_operand.vmem [shape: f32[1,128], index: 2, kind: input, shape index: {}]   ;;  %s591_s3 = inlined_call_operand.hbm [shape: f32[128,128], index: 3, kind: output, shape index: {}]  }
   0x1   :  { %9 = vsyncpa [#allocation6], 0 }
   0x2   :  { %10 = vsyncpa [#allocation4], 0  ;;  %s491_s12 = smov [#allocation2]   ;;  %s419_s16 = scalar_lea.hbm %s588_s0, 2048 }
   0x3   :  { %s16_s13 = sshll.u32 %s491_s12, 4  ;;  %p420_p0 = scmp.ne.s32.totalorder %s588_s0, %s419_s16  ;;  %s17_s13 = int_to_ptr.vmem [resolvable:$true] %s16_s13 }
   0x4   :  { %p423_p1 = scmp.lt.u32.totalorder %s419_s16, %s588_s0 }
   0x6   :  { %p425_p2 = pnand %p423_p1, %p420_p0 }
   0x8   :  { %428 = shalt.err (!%p425_p2)
}
   0x9   :  { %s429_s21 = scalar_lea.vmem %s17_s13, 2048  ;;  %p434_p4 = scmp.lt.s32.totalorder %s17_s13, %s17_s13 }
   0xa   :  { %p430_p3 = scmp.ne.s32.totalorder %s17_s13, %s429_s21  ;;  %p435_p5 = scmp.lt.s32.totalorder %s429_s21, %s429_s21 }
   0xc   :  { %p436_p6 = por %p435_p5, %p434_p4 }
   0xe   :  { %p437_p7 = pnand %p436_p6, %p430_p3 }
  0x10   :  { %440 = shalt.err (!%p437_p7)
}
  0x11   :  { %s492_s22 = smov 128   ;;  %s493_s23 = smov 8  }
  0x12   :  { %22 = dma.hbm_to_vmem [thread:$0]  %s588_s0, 2048, %s17_s13, [#allocation3], %s492_s22, %s492_s22, %s493_s23  }
  0x13   :  { %s494_s26 = smov [#allocation5]   ;;  %s441_s30 = scalar_lea.hbm %s589_s1, 2048 }
  0x14   :  { %s28_s27 = sshll.u32 %s494_s26, 4  ;;  %p442_p8 = scmp.ne.s32.totalorder %s589_s1, %s441_s30  ;;  %s29_s27 = int_to_ptr.vmem [resolvable:$true] %s28_s27 }
  0x15   :  { %p445_p9 = scmp.lt.u32.totalorder %s441_s30, %s589_s1 }
  0x17   :  { %p447_p10 = pnand %p445_p9, %p442_p8 }
  0x19   :  { %450 = shalt.err (!%p447_p10)
}
  0x1a   :  { %s451_s8 = scalar_lea.vmem %s29_s27, 2048  ;;  %p456_p12 = scmp.lt.s32.totalorder %s29_s27, %s29_s27 }
  0x1b   :  { %p452_p11 = scmp.ne.s32.totalorder %s29_s27, %s451_s8  ;;  %p457_p13 = scmp.lt.s32.totalorder %s451_s8, %s451_s8 }
  0x1d   :  { %p458_p0 = por %p457_p13, %p456_p12 }
  0x1f   :  { %p459_p1 = pnand %p458_p0, %p452_p11 }
  0x21   :  { %462 = shalt.err (!%p459_p1)
}
  0x22   :  { %34 = dma.hbm_to_vmem [thread:$0]  %s589_s1, 2048, %s29_s27, [#allocation6], %s492_s22, %s492_s22, %s493_s23  }
  0x23   :  { %485 = dma.done.wait [#allocation3], 2048  }
  0x24   :  { %486 = vsyncadd [#allocation3], 4294965248 }
  0x25   :  { %487 = dma.done.wait [#allocation6], 2048  }
  0x26   :  { %488 = vsyncadd [#allocation6], 4294965248  ;;  %v59_v0 = vld [vmem:[#allocation5] sm:$0xff]  ;;  %v60_v1 = vld [vmem:[#allocation5 + $0x8] sm:$0xff] }
  0x27   :  { %v61_v2 = vld [vmem:[#allocation5 + $0x10] sm:$0xff]  ;;  %v366_v3 = vpack.c.bf16 %v60_v1, %v59_v0  ;;  %v62_v4 = vld [vmem:[#allocation5 + $0x18] sm:$0xff]  ;;  %v63_v6 = vld [vmem:[#allocation5 + $0x20] sm:$0xff] }
  0x28   :  { %v370_v5 = vpack.c.bf16 %v62_v4, %v61_v2  ;;  %v64_v7 = vld [vmem:[#allocation5 + $0x28] sm:$0xff]  ;;  %v546_v9 = vld [vmem:[#allocation2] sm:$0xff]  ;;  %v65_v11 = vld [vmem:[#allocation5 + $0x30] sm:$0xff] }
  0x29   :  { %367 = vmatprep.subr.bf16.mxu0 %v366_v3  ;;  %398 = vmatprep.subr.bf16.mxu1 %v366_v3  ;;  %v374_v8 = vpack.c.bf16 %v64_v7, %v63_v6  ;;  %v548_v10 = vld [vmem:[#allocation2 + $0x40] sm:$0xff]  ;;  %v66_v12 = vld [vmem:[#allocation5 + $0x38] sm:$0xff]  ;;  %v68_v15 = vld [vmem:[#allocation5 + $0x48] sm:$0xff] }
  0x2a   :  { %369 = vmatpush3.bf16.msra.mxu0 %v366_v3  ;;  %406 = vmatpush3.bf16.msra.mxu1 %v366_v3  ;;  %v378_v13 = vpack.c.bf16 %v66_v12, %v65_v11  ;;  %v67_v14 = vld [vmem:[#allocation5 + $0x40] sm:$0xff]  ;;  %v69_v17 = vld [vmem:[#allocation5 + $0x50] sm:$0xff]  ;;  %v70_v18 = vld [vmem:[#allocation5 + $0x58] sm:$0xff] }
  0x2b   :  { %371 = vmatprep.subr.bf16.mxu0 %v370_v5  ;;  %399 = vmatprep.subr.bf16.mxu1 %v370_v5  ;;  %v382_v16 = vpack.c.bf16 %v68_v15, %v67_v14  ;;  %v386_v19 = vpack.c.bf16 %v70_v18, %v69_v17  ;;  %v71_v20 = vld [vmem:[#allocation5 + $0x60] sm:$0xff]  ;;  %v72_v21 = vld [vmem:[#allocation5 + $0x68] sm:$0xff]  ;;  %v73_v23 = vld [vmem:[#allocation5 + $0x70] sm:$0xff] }
  0x2c   :  { %342 = vmatprep.mubr.f32.mxu0 %v546_v9  ;;  %354 = vmatprep.mubr.f32.mxu1 %v548_v10  ;;  %v390_v22 = vpack.c.bf16 %v72_v21, %v71_v20  ;;  %v74_v24 = vld [vmem:[#allocation5 + $0x78] sm:$0xff]  ;;  %v44_v26 = vld [vmem:[#allocation2 + $0x8] sm:$0xff]  ;;  %v45_v28 = vld [vmem:[#allocation2 + $0x10] sm:$0xff] }
  0x2d   :  { %v394_v25 = vpack.c.bf16 %v74_v24, %v73_v23  ;;  %v52_v27 = vld [vmem:[#allocation2 + $0x48] sm:$0xff]  ;;  %v53_v29 = vld [vmem:[#allocation2 + $0x50] sm:$0xff]  ;;  %v46_v30 = vld [vmem:[#allocation2 + $0x18] sm:$0xff] }
  0x2e   :  { %373 = vmatpush3.bf16.msra.mxu0 %v370_v5  ;;  %407 = vmatpush3.bf16.msra.mxu1 %v370_v5  ;;  %v54_v31 = vld [vmem:[#allocation2 + $0x58] sm:$0xff]  ;;  %v47_v32 = vld [vmem:[#allocation2 + $0x20] sm:$0xff]  ;;  %v48_v34 = vld [vmem:[#allocation2 + $0x28] sm:$0xff] }
  0x2f   :  { %375 = vmatprep.subr.bf16.mxu0 %v374_v8  ;;  %400 = vmatprep.subr.bf16.mxu1 %v374_v8  ;;  %v55_v33 = vld [vmem:[#allocation2 + $0x60] sm:$0xff]  ;;  %v56_v35 = vld [vmem:[#allocation2 + $0x68] sm:$0xff]  ;;  %v552_v36 = vld [vmem:[#allocation2 + $0x30] sm:$0xff] }
  0x30   :  { %v554_v37 = vld [vmem:[#allocation2 + $0x70] sm:$0xff]  ;;  %v558_v38 = vld [vmem:[#allocation2 + $0x38] sm:$0xff]  ;;  %v277_v40 = vld [vmem:[%s590_s2] ss:$0 sm:$0xff]  ;;  %s495_s2 = smov [#allocation7]  }
  0x31   :  { %v560_v39 = vld [vmem:[#allocation2 + $0x78] sm:$0xff]  ;;  %s264_s11 = sshll.u32 %s495_s2, 4  ;;  %s265_s11 = int_to_ptr.vmem [resolvable:$true] %s264_s11 }
  0x32   :  { %377 = vmatpush3.bf16.msra.mxu0 %v374_v8  ;;  %408 = vmatpush3.bf16.msra.mxu1 %v374_v8  ;;  %s463_s12 = scalar_lea.vmem %s265_s11, 2048  ;;  %p468_p3 = scmp.lt.s32.totalorder %s265_s11, %s265_s11 }
  0x33   :  { %379 = vmatprep.subr.bf16.mxu0 %v378_v13  ;;  %401 = vmatprep.subr.bf16.mxu1 %v378_v13  ;;  %p464_p2 = scmp.ne.s32.totalorder %s265_s11, %s463_s12  ;;  %p469_p4 = scmp.lt.s32.totalorder %s463_s12, %s463_s12 }
  0x35   :  { %p470_p5 = por %p469_p4, %p468_p3 }
  0x36   :  { %381 = vmatpush3.bf16.msra.mxu0 %v378_v13  ;;  %409 = vmatpush3.bf16.msra.mxu1 %v378_v13 }
  0x37   :  { %383 = vmatprep.subr.bf16.mxu0 %v382_v16  ;;  %402 = vmatprep.subr.bf16.mxu1 %v382_v16  ;;  %p471_p6 = pnand %p470_p5, %p464_p2 }
  0x3a   :  { %385 = vmatpush3.bf16.msra.mxu0 %v382_v16  ;;  %410 = vmatpush3.bf16.msra.mxu1 %v382_v16 }
  0x3b   :  { %387 = vmatprep.subr.bf16.mxu0 %v386_v19  ;;  %403 = vmatprep.subr.bf16.mxu1 %v386_v19 }
  0x3e   :  { %389 = vmatpush3.bf16.msra.mxu0 %v386_v19  ;;  %411 = vmatpush3.bf16.msra.mxu1 %v386_v19 }
  0x3f   :  { %391 = vmatprep.subr.bf16.mxu0 %v390_v22  ;;  %404 = vmatprep.subr.bf16.mxu1 %v390_v22 }
  0x42   :  { %393 = vmatpush3.bf16.msra.mxu0 %v390_v22  ;;  %412 = vmatpush3.bf16.msra.mxu1 %v390_v22 }
  0x43   :  { %395 = vmatprep.subr.bf16.mxu0 %v394_v25  ;;  %405 = vmatprep.subr.bf16.mxu1 %v394_v25 }
  0x46   :  { %397 = vmatpush3.bf16.msra.mxu0 %v394_v25  ;;  %413 = vmatpush3.bf16.msra.mxu1 %v394_v25 }
  0x49   :  { %343 = vmatmul.mubr.f32.vlgmr.msra.gmra.mrb[0].mxu0 %v44_v26  ;;  %355 = vmatmul.mubr.f32.vlgmr.msra.gmra.mrb[0].mxu1 %v52_v27 }
  0x4a   :  { %345 = vmatprep.mubr.f32.mxu0 %v45_v28  ;;  %357 = vmatprep.mubr.f32.mxu1 %v53_v29 }
  0x4d   :  { %346 = vmatmul.mubr.f32.gmra.mrb[2].mxu0 %v46_v30  ;;  %358 = vmatmul.mubr.f32.gmra.mrb[2].mxu1 %v54_v31 }
  0x4e   :  { %348 = vmatprep.mubr.f32.mxu0 %v47_v32  ;;  %360 = vmatprep.mubr.f32.mxu1 %v55_v33 }
  0x51   :  { %349 = vmatmul.mubr.f32.gmra.mrb[4].mxu0 %v48_v34  ;;  %361 = vmatmul.mubr.f32.gmra.mrb[4].mxu1 %v56_v35 }
  0x52   :  { %351 = vmatprep.mubr.f32.mxu0 %v552_v36  ;;  %363 = vmatprep.mubr.f32.mxu1 %v554_v37 }
  0x55   :  { %352 = vmatmul.mubr.f32.gmra.mrb[6].mxu0 %v558_v38  ;;  %364 = vmatmul.mubr.f32.gmra.mrb[6].mxu1 %v560_v39 }
 0x11c   :  { %v344_v41 = vpop.f32.mrb[0].mxu0  ;;  %v356_v42 = vpop.f32.mrb[0].mxu1 }
 0x11d   :  { %v154_v43 = vadd.f32 %v344_v41, %v277_v40  ;;  %v194_v44 = vadd.f32 %v356_v42, %v277_v40  ;;  %v148_v45 = vpop.f32.mrb[1].mxu0  ;;  %v188_v46 = vpop.f32.mrb[1].mxu1 }
 0x11e   :  { %v149_v47 = vadd.f32 %v277_v40, %v148_v45  ;;  %v189_v48 = vadd.f32 %v277_v40, %v188_v46 }
 0x11f   :  { %v228_v49 = vadd.f32 %v154_v43, %v44_v26  ;;  %v236_v50 = vadd.f32 %v194_v44, %v52_v27 }
 0x120   :  { %v227_v51 = vadd.f32 %v149_v47, %v546_v9  ;;  %v235_v52 = vadd.f32 %v189_v48, %v548_v10  ;;  %v347_v53 = vpop.f32.mrb[2].mxu0  ;;  %v359_v54 = vpop.f32.mrb[2].mxu1 }
 0x121   :  { %244 = vst [vmem:[#allocation7 + $0x8] sm:$0xff] %v228_v49  ;;  %252 = vst [vmem:[#allocation7 + $0x48] sm:$0xff] %v236_v50  ;;  %v164_v55 = vadd.f32 %v347_v53, %v277_v40  ;;  %v204_v56 = vadd.f32 %v359_v54, %v277_v40  ;;  %v158_v57 = vpop.f32.mrb[3].mxu0  ;;  %v198_v58 = vpop.f32.mrb[3].mxu1 }
 0x122   :  { %243 = vst [vmem:[#allocation7] sm:$0xff] %v227_v51  ;;  %251 = vst [vmem:[#allocation7 + $0x40] sm:$0xff] %v235_v52  ;;  %v159_v59 = vadd.f32 %v277_v40, %v158_v57  ;;  %v199_v60 = vadd.f32 %v277_v40, %v198_v58 }
 0x123   :  { %v230_v61 = vadd.f32 %v164_v55, %v46_v30  ;;  %v238_v62 = vadd.f32 %v204_v56, %v54_v31 }
 0x124   :  { %v229_v63 = vadd.f32 %v159_v59, %v45_v28  ;;  %v237_v0 = vadd.f32 %v199_v60, %v53_v29  ;;  %v350_v1 = vpop.f32.mrb[4].mxu0  ;;  %v362_v2 = vpop.f32.mrb[4].mxu1 }
 0x125   :  { %246 = vst [vmem:[#allocation7 + $0x18] sm:$0xff] %v230_v61  ;;  %254 = vst [vmem:[#allocation7 + $0x58] sm:$0xff] %v238_v62  ;;  %v174_v3 = vadd.f32 %v350_v1, %v277_v40  ;;  %v214_v4 = vadd.f32 %v362_v2, %v277_v40  ;;  %v168_v5 = vpop.f32.mrb[5].mxu0  ;;  %v208_v6 = vpop.f32.mrb[5].mxu1 }
 0x126   :  { %245 = vst [vmem:[#allocation7 + $0x10] sm:$0xff] %v229_v63  ;;  %253 = vst [vmem:[#allocation7 + $0x50] sm:$0xff] %v237_v0  ;;  %v169_v7 = vadd.f32 %v277_v40, %v168_v5  ;;  %v209_v8 = vadd.f32 %v277_v40, %v208_v6 }
 0x127   :  { %v232_v9 = vadd.f32 %v174_v3, %v48_v34  ;;  %v240_v10 = vadd.f32 %v214_v4, %v56_v35 }
 0x128   :  { %v231_v11 = vadd.f32 %v169_v7, %v47_v32  ;;  %v239_v12 = vadd.f32 %v209_v8, %v55_v33  ;;  %v353_v13 = vpop.f32.mrb[6].mxu0  ;;  %v365_v14 = vpop.f32.mrb[6].mxu1 }
 0x129   :  { %248 = vst [vmem:[#allocation7 + $0x28] sm:$0xff] %v232_v9  ;;  %256 = vst [vmem:[#allocation7 + $0x68] sm:$0xff] %v240_v10  ;;  %v184_v15 = vadd.f32 %v353_v13, %v277_v40  ;;  %v224_v16 = vadd.f32 %v365_v14, %v277_v40  ;;  %v178_v17 = vpop.f32.mrb[7].mxu0  ;;  %v218_v18 = vpop.f32.mrb[7].mxu1 }
 0x12a   :  { %247 = vst [vmem:[#allocation7 + $0x20] sm:$0xff] %v231_v11  ;;  %255 = vst [vmem:[#allocation7 + $0x60] sm:$0xff] %v239_v12  ;;  %v179_v19 = vadd.f32 %v277_v40, %v178_v17  ;;  %v219_v20 = vadd.f32 %v277_v40, %v218_v18 }
 0x12b   :  { %v234_v21 = vadd.f32 %v184_v15, %v558_v38  ;;  %v242_v22 = vadd.f32 %v224_v16, %v560_v39 }
 0x12c   :  { %v233_v23 = vadd.f32 %v179_v19, %v552_v36  ;;  %v241_v24 = vadd.f32 %v219_v20, %v554_v37 }
 0x12d   :  { %250 = vst [vmem:[#allocation7 + $0x38] sm:$0xff] %v234_v21  ;;  %258 = vst [vmem:[#allocation7 + $0x78] sm:$0xff] %v242_v22 }
 0x12e   :  { %249 = vst [vmem:[#allocation7 + $0x30] sm:$0xff] %v233_v23  ;;  %257 = vst [vmem:[#allocation7 + $0x70] sm:$0xff] %v241_v24 }
 0x12f   :  { %474 = shalt.err (!%p471_p6)
}
 0x130   :  { %s475_s15 = scalar_lea.hbm %s591_s3, 2048 }
 0x131   :  { %p476_p7 = scmp.ne.s32.totalorder %s591_s3, %s475_s15  ;;  %p479_p8 = scmp.lt.u32.totalorder %s475_s15, %s591_s3 }
 0x133   :  { %p481_p9 = pnand %p479_p8, %p476_p7 }
 0x135   :  { %484 = shalt.err (!%p481_p9)
}
 0x136   :  { %270 = dma.vmem_to_hbm [thread:$0]  %s265_s11, 2048, %s591_s3, [#allocation4], %s492_s22, %s492_s22, %s493_s23  }
 0x137   :  { %489 = dma.done.wait [#allocation4], 2048  }
 0x138   :  { %490 = vsyncadd [#allocation4], 4294965248 }
 0x139   :  { %274 = vsyncpa [#allocation3], 1 }
 0x13a   :  { %275 = vsyncpa [#allocation6], 1 }
 0x13b   :  { %276 = vsyncpa [#allocation4], 1 }

</bundles_post_ra>
